<compile_context>
chip_gen: v5e
topology: v5e:2x2
jax: 0.10.0
libtpu: 0.0.40
codegen_flags: <defaults>
</compile_context>

<pallas_src>
import math

import jax
import jax.numpy as jnp
from jax.experimental import pallas as pl
from jax.experimental.pallas import tpu as pltpu

_LANES = 128
_MIN_PALLAS_BYTES = 256 * 1024      # below this, XLA's fused multiply wins
_MAX_SAMPLES_PER_BLOCK = 64         # bounds the static unroll in the kernel


def _target_block_bytes() -> int:
    # ~4 MiB blocks on v7x (64 MiB VMEM, 3.2 TB/s HBM); 2 MiB elsewhere
    # (safe inside v5e's 16 MiB scoped-VMEM default once double-buffered).
    try:
        info = pltpu.get_tpu_info()
        if info.vmem_capacity_bytes <= 64 * 1024 * 1024:
            return 4 * 1024 * 1024
    except Exception:
        pass
    return 2 * 1024 * 1024


def _drop_path_kernel(scale_ref, x_ref, o_ref):
    # scale_ref: (b,) float32 in SMEM (scalar prefetch).
    # x_ref/o_ref: (TB, tile_rows, 128) blocks.
    bi = pl.program_id(0)
    tb = x_ref.shape[0]
    for t in range(tb):  # static unroll, tb <= _MAX_SAMPLES_PER_BLOCK
        o_ref[t] = (x_ref[t] * scale_ref[bi * tb + t]).astype(o_ref.dtype)


def drop_path(x, drop_prob: float = 0.0, training: bool = False, key=None,
              *, min_pallas_bytes: int = _MIN_PALLAS_BYTES):
    """JAX/Pallas equivalent of mmf's drop_path()."""
    if drop_prob == 0.0 or not training:
        return x
    if key is None:
        raise ValueError("drop_path: a PRNG `key` is required when training "
                         "with drop_prob > 0.")

    keep_prob = 1.0 - drop_prob
    b = x.shape[0]
    n = math.prod(x.shape[1:]) if x.ndim > 1 else 1

    # Per-sample Bernoulli(keep_prob) mask in float32 (exact threshold even for
    # bf16 inputs), folded with 1/keep_prob into one scalar per sample.
    # TODO(synk): drop_prob == 1.0 yields NaN scale, matching the torch
    # reference's x.div(0) * 0 failure mode.
    rand = jax.random.uniform(key, (b,), dtype=jnp.float32)
    mask = jnp.floor(jnp.float32(keep_prob) + rand)
    scale = mask / jnp.float32(keep_prob)           # (b,) float32 -> SMEM

    itemsize = jnp.dtype(x.dtype).itemsize
    total_bytes = b * n * itemsize

    if n == 0 or n % _LANES != 0 or total_bytes < min_pallas_bytes:
        # Ragged or tiny tensor: plain XLA broadcast-multiply (no pad/slice,
        # no extra HBM passes, no pallas_call launch overhead).
        bshape = (b,) + (1,) * (x.ndim - 1)
        return (x * scale.reshape(bshape)).astype(x.dtype)

    rows = n // _LANES
    sub = max(8, 32 // itemsize)        # sublane multiple per dtype packing
    target = _target_block_bytes()
    per_sample_bytes = rows * _LANES * itemsize

    if per_sample_bytes <= target:
        # Whole sample per block; batch several samples to reach ~target bytes.
        tile_rows = rows
        nj = 1
        tb_desired = min(_MAX_SAMPLES_PER_BLOCK,
                         max(1, target // per_sample_bytes))
        if b >= 2:
            # Keep at least 2 batch blocks so both v7x TensorCores get work.
            tb_desired = min(tb_desired, max(1, b // 2))
        tb = 1
        for cand in range(min(tb_desired, b), 0, -1):
            if b % cand == 0:           # exact divisor -> no partial blocks
                tb = cand
                break
        nb = b // tb
    else:
        # Large per-sample slab: tile rows, tile-count-first sizing so the
        # padded waste is < `sub` rows per tile.
        tb = 1
        nb = b
        max_rows = max(sub, (target // (_LANES * itemsize)) // sub * sub)
        nt = pl.cdiv(rows, max_rows)
        tile_rows = ((pl.cdiv(rows, nt) + sub - 1) // sub) * sub
        nj = pl.cdiv(rows, tile_rows)   # last block may be partial (masked)

    x3d = x.reshape(b, rows, _LANES)    # free bitcast (n % 128 == 0)

    block_bytes = tb * tile_rows * _LANES * itemsize
    vmem_limit = min(64 * 1024 * 1024, 4 * block_bytes + (16 << 20))

    out3d = pl.pallas_call(
        _drop_path_kernel,
        out_shape=jax.ShapeDtypeStruct((b, rows, _LANES), x.dtype),
        grid_spec=pltpu.PrefetchScalarGridSpec(
            num_scalar_prefetch=1,
            grid=(nb, nj),
            in_specs=[
                pl.BlockSpec((tb, tile_rows, _LANES),
                             lambda i, j, s: (i, j, 0)),
            ],
            out_specs=pl.BlockSpec((tb, tile_rows, _LANES),
                                   lambda i, j, s: (i, j, 0)),
        ),
        compiler_params=pltpu.CompilerParams(
            dimension_semantics=("parallel", "parallel"),
            vmem_limit_bytes=vmem_limit,
        ),
        cost_estimate=pl.CostEstimate(
            flops=b * n, transcendentals=0, bytes_accessed=2 * total_bytes),
    )(scale, x3d)

    return out3d.reshape(x.shape)


class DropPath:
    """Drop paths (Stochastic Depth) per sample — Pallas-backed forward."""

    def __init__(self, drop_prob=None):
        self.drop_prob = drop_prob if drop_prob is not None else 0.0
        self.training = True  # mimic nn.Module default mode

    def __call__(self, x, key=None, min_pallas_bytes=_MIN_PALLAS_BYTES):
        return drop_path(x, self.drop_prob, self.training, key=key,
                         min_pallas_bytes=min_pallas_bytes)


if __name__ == "__main__":
    key = jax.random.PRNGKey(0)
    kx, kmask, kx2, kx3 = jax.random.split(key, 4)

    module = DropPath(drop_prob=0.25)
    module.training = True
    keep_prob = 1.0 - module.drop_prob

    # --- 1) Small NCHW input, forced through the Pallas path (f32). ---
    B, C, H, W = 2, 4, 16, 16
    x = jax.random.normal(kx, (B, C, H, W), dtype=jnp.float32)
    out = jax.block_until_ready(module(x, key=kmask, min_pallas_bytes=0))

    rand = jax.random.uniform(kmask, (B,), dtype=jnp.float32)
    mask = jnp.floor(jnp.float32(keep_prob) + rand).reshape(B, 1, 1, 1)
    ref = x / keep_prob * mask
    assert out.shape == x.shape and out.dtype == x.dtype
    assert jnp.allclose(out, ref, atol=1e-6, rtol=1e-5)

    # --- 2) bf16 through the Pallas path (scale math stays f32). ---
    x_bf16 = x.astype(jnp.bfloat16)
    out_bf16 = jax.block_until_ready(module(x_bf16, key=kmask, min_pallas_bytes=0))
    ref_bf16 = (x_bf16.astype(jnp.float32) * (mask / keep_prob)).astype(jnp.bfloat16)
    assert out_bf16.dtype == jnp.bfloat16
    assert jnp.allclose(out_bf16.astype(jnp.float32), ref_bf16.astype(jnp.float32),
                        atol=1e-2, rtol=2e-2)

    # --- 3) Larger batch: exercises the multi-sample-per-block kernel path. ---
    x8 = jax.random.normal(kx3, (8, 4, 16, 16), dtype=jnp.float32)
    out8 = jax.block_until_ready(module(x8, key=kmask, min_pallas_bytes=0))
    rand8 = jax.random.uniform(kmask, (8,), dtype=jnp.float32)
    mask8 = jnp.floor(jnp.float32(keep_prob) + rand8).reshape(8, 1, 1, 1)
    assert jnp.allclose(out8, x8 / keep_prob * mask8, atol=1e-6, rtol=1e-5)

    # --- 4) Ragged flattened size -> fused XLA fallback (no pad/slice). ---
    x_r = jax.random.normal(kx2, (2, 3, 5, 7), dtype=jnp.float32)
    out_r = jax.block_until_ready(module(x_r, key=kmask))
    rand_r = jax.random.uniform(kmask, (2,), dtype=jnp.float32)
    mask_r = jnp.floor(jnp.float32(keep_prob) + rand_r).reshape(2, 1, 1, 1)
    assert jnp.allclose(out_r, x_r / keep_prob * mask_r, atol=1e-6, rtol=1e-5)

    # --- 5) Eval mode / drop_prob == 0 must be identity. ---
    module.training = False
    assert jnp.array_equal(jax.block_until_ready(module(x, key=kmask)), x)
    module.training = True
    module.drop_prob = 0.0
    assert jnp.array_equal(jax.block_until_ready(module(x, key=kmask)), x)

    print("KERNEL_OK")
</pallas_src>

<mosaic_0001>
module attributes {stable_mosaic.version = 11 : i64} {
  func.func @_drop_path_kernel(%arg0: i32, %arg1: i32, %arg2: memref<2xf32, #tpu.memory_space<smem>>, %arg3: memref<1x8x128xf32, #tpu.memory_space<vmem>>, %arg4: memref<1x8x128xf32, #tpu.memory_space<vmem>>) attributes {dimension_semantics = [#tpu.dimension_semantics<parallel>, #tpu.dimension_semantics<parallel>], iteration_bounds = array<i64: 2, 1>, scalar_prefetch = 1 : i64, scratch_operands = 0 : i64, tpu.core_type = #tpu.core_type<tc>, window_params = [{transform_indices = @transform_0, window_bounds = array<i64: 1, 8, 128>}, {transform_indices = @transform_1, window_bounds = array<i64: 1, 8, 128>}]} {
    %c0 = arith.constant 0 : index
    %c0_0 = arith.constant 0 : index
    %c0_1 = arith.constant 0 : index
    %0 = vector.load %arg3[%c0, %c0_0, %c0_1] : memref<1x8x128xf32, #tpu.memory_space<vmem>>, vector<1x8x128xf32>
    %1 = vector.shape_cast %0 : vector<1x8x128xf32> to vector<8x128xf32>
    %c1_i32 = arith.constant 1 : i32
    %2 = arith.muli %arg0, %c1_i32 : i32
    %c0_i32 = arith.constant 0 : i32
    %3 = arith.addi %2, %c0_i32 : i32
    %4 = arith.index_cast %3 : i32 to index
    %5 = memref.load %arg2[%4] : memref<2xf32, #tpu.memory_space<smem>>
    %6 = vector.broadcast %5 : f32 to vector<8x128xf32>
    %7 = arith.mulf %1, %6 : vector<8x128xf32>
    %c0_2 = arith.constant 0 : index
    %c0_3 = arith.constant 0 : index
    %c0_4 = arith.constant 0 : index
    %8 = vector.load %arg4[%c0_2, %c0_3, %c0_4] : memref<1x8x128xf32, #tpu.memory_space<vmem>>, vector<1x8x128xf32>
    %9 = vector.shape_cast %8 : vector<1x8x128xf32> to vector<8x128xf32>
    %10 = vector.shape_cast %7 : vector<8x128xf32> to vector<1x8x128xf32>
    tpu.vector_store %arg4[%c0_2, %c0_3, %c0_4], %10 {strides = array<i32>} : memref<1x8x128xf32, #tpu.memory_space<vmem>>, vector<1x8x128xf32>,
    return
  }
  func.func @transform_0(%arg0: i32, %arg1: i32, %arg2: memref<2xf32, #tpu.memory_space<smem>>) -> (i32, i32, i32) {
    %c0_i32 = arith.constant 0 : i32
    %c0_i32_0 = arith.constant 0 : i32
    return %arg0, %arg1, %c0_i32 : i32, i32, i32
  }
  func.func @transform_1(%arg0: i32, %arg1: i32, %arg2: memref<2xf32, #tpu.memory_space<smem>>) -> (i32, i32, i32) {
    %c0_i32 = arith.constant 0 : i32
    %c0_i32_0 = arith.constant 0 : i32
    return %arg0, %arg1, %c0_i32 : i32, i32, i32
  }
}

</mosaic_0001>

<bundles_post_ra>
// kernel: tpu_custom_call.1
= control target key start
LH: loop header
LB: loop body
LE: loop exit
PB: predicated region body
PF: predicated region fallthrough
CT: control target
= control target key end

     0   :  { %s466_s12 = smov [#allocation3]   ;;  %s606_s0 = inlined_call_operand.hbm [shape: f32[2], index: 0, kind: input, shape index: {}]   ;;  %s607_s1 = inlined_call_operand.hbm [shape: f32[2,8,128], index: 1, kind: input, shape index: {}]   ;;  %s608_s2 = inlined_call_operand.hbm [shape: f32[2,8,128], index: 2, kind: output, shape index: {}]  }
   0x1   :  { %s8_s11 = sshll.u32 %s606_s0, 4  ;;  %s9_s11 = int_to_ptr.hbm [resolvable:$true] %s8_s11 }
   0x2   :  { %11 = dma.hbm_to_smem %s9_s11, 16, %s466_s12, [#allocation2] }
   0x3   :  { %432 = dma.done.wait [#allocation2], 16 }
   0x4   :  { %433 = vsyncadd [#allocation2], 4294967280 }
   0x5   :  { %14 = sfence }
   0x6   :  { %15 = vsyncpa [#allocation5], 0 }
   0x7   :  { %17 = vsyncpa [#allocation5 + $0x1], 0 }
   0x8   :  { %18 = vsyncpa [#allocation6], 0 }
   0x9   :  { %20 = vsyncpa [#allocation6 + $0x1], 0  ;;  %s485_s13 = smov 0   ;;  %s487_s14 = smov 0  }
   0xa   :  { %s489_s15 = smov 0   ;;  %s491_s16 = smov 0  }
   0xb   :  { %s493_s17 = smov 0   ;;  %s495_s0 = smov 0  }
   0xc LB: > { %s262_s18 = sadd.s32 4294967295, %s464_s0   ;;  %s263_s19 = sadd.s32 4294967294, %s464_s0   ;;  %s464_s0 = sphi %s495_s0, %s26_s0   ;;  %s460_s17 = sphi %s493_s17, %s617_s17   ;;  %s456_s16 = sphi %s491_s16, %s616_s16   ;;  %s452_s15 = sphi %s489_s15, %s615_s15   ;;  %s448_s14 = sphi %s487_s14, %s614_s14   ;;  %s444_s13 = sphi %s485_s13, %s613_s13  }
   0xd   : > { %s38_s20 = sadd.s32 1, %s460_s17  ;;  %s47_s21 = sadd.s32 1, %s452_s15 }
   0xe   : > { %p40_p0 = scmp.ge.s32.totalorder %s38_s20, 2  ;;  %p54_p1 = scmp.ne.s32.totalorder %s452_s15, %s448_s14 }
   0xf   : > { %p55_p2 = scmp.eq.s32.totalorder %s464_s0, 0  ;;  %p60_p3 = scmp.ne.s32.totalorder %s448_s14, %s444_s13 }
  0x10   : > { %s619_s20 = smov (%p40_p0, %s38_s20), 0  ;;  %p61_p5 = scmp.eq.s32.totalorder %s262_s18, 0 }
  0x11   : > { %p526_p4 = por %p55_p2, %p54_p1  ;;  %s42_s23 = ssub.s32 %s460_s17, %s619_s20 }
  0x12   : > { %p86_p6 = scmp.eq.s32.totalorder %s262_s18, 1  ;;  %p45_p7 = scmp.eq.s32.totalorder %s42_s23, 0 }
  0x13   : > { %p532_p8 = por %p61_p5, %p60_p3  ;;  %p92_p10 = scmp.eq.s32.totalorder %s263_s19, 1 }
  0x14   : > { %p536_p9 = por %p86_p6, %p54_p1  ;;  %p265_p12 = scmp.ge.s32.totalorder %s464_s0, 2 }
  0x15   : > { %s541_s26 = scalar_select %p45_p7, %s452_s15, %s47_s21  }
  0x16   : > { %p543_p11 = por %p92_p10, %p60_p3  ;;  %p287_p13 = scmp.lt.s32.totalorder %s464_s0, 2 }
  0x17   : > { %s112_s28 = sand.u32 1, %s452_s15   ;;  %s267_s30 = sshll.u32 %s460_s17, 3 }
  0x18   : > { %s266_s29 = sshll.u32 %s112_s28, 3  ;;  %s121_s5 = scalar_lea.hbm %s607_s1, %s267_s30 }
  0x19   : > { %s116_s6 = scalar_lea.vmem [#allocation4], %s266_s29  ;;  %s123_s8 = sshll.u32 %s121_s5, 4  ;;  %s124_s8 = int_to_ptr.hbm [resolvable:$true] %s123_s8 }
  0x1a   : > { %s125_s7 = sshll.u32 %s116_s6, 4  ;;  %p280_p0 = pnand %p287_p13, %p526_p4  ;;  %s126_s7 = int_to_ptr.vmem [resolvable:$true] %s125_s7 }
  0x1b   : > { %p268_p1 = scmp.ge.s32.totalorder %s464_s0, 1  ;;  %p130_p2 = scmp.lt.s32.totalorder %s464_s0, 3 }
  0x1c   : > { %s113_s9 = scalar_lea.sflag [#allocation5], %s112_s28 }
  0x1d   : > { %282 = dma.hbm_to_vmem [thread:$0]  (!%p280_p0), %s124_s8, 128, %s126_s7, %s113_s9  }
  0x1e   : > { %p131_p3 = pnand %p268_p1, %p130_p2 }
  0x1f   : > { %s559_s10 = sand.u32 (!%p131_p3), 1, %s448_s14  }
  0x20   : > { %134 = sbr.rel (%p131_p3) target bundleno = 53 (0x35), region = 24  ;;  %s269_s11 = sshll.u32 (!%p131_p3), %s559_s10, 3 }
  0x21   : > { %s137_s12 = scalar_lea.sflag (!%p131_p3), [#allocation5], %s559_s10  ;;  %s140_s18 = scalar_lea.vmem (!%p131_p3), [#allocation4], %s269_s11 }
  0x25   : > { %435 = dma.done.wait (%p532_p8), %s137_s12, 128  }
  0x26   : > { %437 = vsyncadd (%p532_p8), %s137_s12, 4294967168  ;;  %s161_s19 = sld [smem:[#allocation3 + %s456_s16]]  ;;  %s272_s21 = sshll.u32 %s456_s16, 3  ;;  %v160_v0 = vld [vmem:[%s140_s18] sm:$0xff] }
  0x27   : > { %s177_s28 = scalar_lea.hbm %s608_s2, %s272_s21  ;;  %s159_s29 = scalar_lea.vmem [#allocation7], %s269_s11 }
  0x28   : > { %s179_s30 = sshll.u32 %s159_s29, 4  ;;  %s181_s3 = sshll.u32 %s177_s28, 4  ;;  %s180_s30 = int_to_ptr.vmem [resolvable:$true] %s179_s30  ;;  %s182_s3 = int_to_ptr.hbm [resolvable:$true] %s181_s3 }
  0x29   : > { %s166_s24 = scalar_lea.sflag [#allocation6], %s559_s10  ;;  %s394_s4 = sshra.s32 %s182_s3, 4  ;;  %s395_s4 = int_to_ptr.hbm [resolvable:$true] %s394_s4 }
  0x2a   : > { %s396_s5 = scalar_lea.hbm %s395_s4, 8  ;;  %s400_s7 = scalar_lea.hbm %s608_s2, 16 }
  0x2b   : > { %p397_p4 = scmp.ne.s32.totalorder %s395_s4, %s396_s5  ;;  %p401_p7 = scmp.lt.s32.totalorder %s395_s4, %s608_s2 }
  0x2c   : > { %v162_v1 = vstv %s161_s19  ;;  %p402_p8 = scmp.lt.s32.totalorder %s400_s7, %s396_s5 }
  0x2d   : > { %v163_v2 = vmul.f32 %v162_v1, %v160_v0  ;;  %p398_p5 = pnand %p397_p4, %p536_p9 }
  0x2e   : > { %p403_p10 = por %p402_p8, %p401_p7 }
  0x2f   : > { %164 = vst [vmem:[%s159_s29] sm:$0xff] %v163_v2  ;;  %p399_p6 = pneg %p398_p5 }
  0x31   : > { %p404_p13 = pnand %p403_p10, %p399_p6 }
  0x33   : > { %407 = shalt.err (!%p404_p13)
}
  0x34   : > { %277 = dma.vmem_to_hbm [thread:$0]  (%p536_p9), %s180_s30, 128, %s182_s3, %s166_s24  }
  0x35 PF: > { %s193_s10 = sand.u32 1, %s444_s13   ;;  %p284_p0 = pnand %p265_p12, %p543_p11 }
  0x36   : > { %s194_s11 = scalar_lea.sflag [#allocation6], %s193_s10 }
  0x37   : > { %p285_p1 = pneg %p284_p0 }
  0x39   : > { %439 = dma.done.wait (%p285_p1), %s194_s11, 128  }
  0x3a   : > { %441 = vsyncadd (%p285_p1), %s194_s11, 4294967168  ;;  %s26_s0 = sadd.s32 1, %s464_s0   ;;  %s613_s13 = smov %s448_s14 }
  0x3b   : > { %p23_p2 = scmp.ge.s32.totalorder %s26_s0, 4   ;;  %s614_s14 = smov %s452_s15 }
  0x3c   : > { %s615_s15 = smov %s541_s26  ;;  %s616_s16 = smov %s460_s17 }
  0x3d   : > { %s617_s17 = smov %s619_s20  ;;  %25 = sbr.rel (!%p23_p2) target bundleno = 12 (0xc), region = 69 }
  0x42   :  { %200 = vsyncpa [#allocation5], 1 }
  0x43   :  { %202 = vsyncpa [#allocation5 + $0x1], 1 }
  0x44   :  { %203 = vsyncpa [#allocation6], 1 }
  0x45   :  { %205 = vsyncpa [#allocation6 + $0x1], 1 }

</bundles_post_ra>
